<compile_context>
chip_gen: v7x
topology: tpu7x:2x2x1
jax: 0.10.0
libtpu: 0.0.40
codegen_flags: <defaults>
</compile_context>

<pallas_src>
import functools
import math

import jax
import jax.numpy as jnp
import numpy as np
from jax.experimental import pallas as pl
from jax.experimental.pallas import tpu as pltpu


# ---------------------------------------------------------------------------
# Deterministic "parameters" (the module's registered buffers), built on host.
# ---------------------------------------------------------------------------
def _idft_matrix_np(n):
    """Complex IDFT matrix (real, imag), each (n, n). Matches
    MatrixIRFFT2._create_idft_matrix."""
    k = np.arange(n, dtype=np.float64)[:, None]
    j = np.arange(n, dtype=np.float64)[None, :]
    ang = 2.0 * math.pi * k * j / n
    return (np.cos(ang) / n).astype(np.float32), (np.sin(ang) / n).astype(np.float32)


def _real_idft_matrix_np(n):
    """Half-spectrum -> real IDFT matrix (real, imag), each (n, n//2+1), including the
    interior-frequency x2 scaling (DC / Nyquist stay x1). Matches
    MatrixIRFFT2._create_real_idft_matrix."""
    nf = n // 2 + 1
    j = np.arange(n, dtype=np.float64)[:, None]
    k = np.arange(nf, dtype=np.float64)[None, :]
    ang = 2.0 * math.pi * j * k / n
    real = np.cos(ang) / n
    imag = np.sin(ang) / n
    scaling = np.ones((nf,), np.float64)
    if n % 2 == 0:
        scaling[1:nf - 1] *= 2.0
    else:
        scaling[1:nf] *= 2.0
    return (real * scaling).astype(np.float32), (imag * scaling).astype(np.float32)


@functools.lru_cache(maxsize=None)
def _fused_operator(height, width):
    """Fused height x width IDFT as one real matrix T of shape
    (H*(W//2+1)*2, H*W), so that x.reshape(B, H*Wf*2) @ T == irfft2(x).reshape(B, H*W).
    Built once on the host (numpy) and cached as a device array."""
    wf = width // 2 + 1
    hr, hi = _idft_matrix_np(height)      # (H, H)   MH[h, p]
    wr, wi = _real_idft_matrix_np(width)  # (W, Wf)  MW[w, k] (scaled)
    # out[b,h,w] = sum_{p,k} Xr[b,p,k]*(hr*wr - hi*wi) - Xi[b,p,k]*(hi*wr + hr*wi)
    t_r = np.einsum('hp,wk->pkhw', hr, wr) - np.einsum('hp,wk->pkhw', hi, wi)
    t_i = -(np.einsum('hp,wk->pkhw', hi, wr) + np.einsum('hp,wk->pkhw', hr, wi))
    t = np.stack([t_r, t_i], axis=2)      # (H, Wf, 2, H, W)
    t = t.reshape(height * wf * 2, height * width).astype(np.float32)
    return jnp.asarray(t)


@functools.lru_cache(maxsize=None)
def _separable_operators(height, width):
    """Operators for the separable (large H,W) path.
    TH: (2H, 2H) real matrix — complex height IDFT on rows laid out interleaved (p, re/im).
    TW: (2Wf, W) real matrix — complex->real width IDFT (scaled) on rows interleaved (k, re/im)."""
    H, W = height, width
    wf = W // 2 + 1
    hr, hi = _idft_matrix_np(H)
    wr, wi = _real_idft_matrix_np(W)
    th = np.zeros((2 * H, 2 * H), np.float32)
    th[0::2, 0::2] = hr.T      # Xr[p] -> Yr[h] : +hr[h,p]
    th[1::2, 0::2] = -hi.T     # Xi[p] -> Yr[h] : -hi[h,p]
    th[0::2, 1::2] = hi.T      # Xr[p] -> Yi[h] : +hi[h,p]
    th[1::2, 1::2] = hr.T      # Xi[p] -> Yi[h] : +hr[h,p]
    tw = np.zeros((2 * wf, W), np.float32)
    tw[0::2, :] = wr.T         # Yr[k] -> out[w] : +wr[w,k]
    tw[1::2, :] = -wi.T        # Yi[k] -> out[w] : -wi[w,k]
    return jnp.asarray(th), jnp.asarray(tw)


# ---------------------------------------------------------------------------
# Generic row-tiled Pallas GEMM: out = x2d @ op, operator resident across the grid.
# ---------------------------------------------------------------------------
def _gemm_kernel(x_ref, op_ref, o_ref):
    # x_ref: (TB, K), op_ref: (K, N), o_ref: (TB, N) — single MXU GEMM per tile.
    o_ref[...] = jnp.dot(x_ref[...], op_ref[...],
                         preferred_element_type=jnp.float32)


def _cdiv(a, b):
    return -(-a // b)


def _round_up(a, b):
    return ((a + b - 1) // b) * b


def _num_tensorcores():
    """Best-effort TensorCores-per-device count (v7x exposes 2; v5e/v6e expose 1).
    Defaults to 1 when unknown, which is the safe single-TC behavior."""
    try:
        dev = jax.devices()[0]
        for attr in ("num_cores", "core_count"):
            v = getattr(dev, attr, None)
            if isinstance(v, int) and v > 0:
                return v
    except Exception:
        pass
    return 1


def _row_gemm(x2d, op, *, tile_cap=2048):
    m, k = x2d.shape
    k2, n = op.shape
    assert k == k2
    num_tc = _num_tensorcores()

    # --- batch-tile selection (VMEM-budget aware, sublane aligned) ---------------
    row_bytes = 4 * (k + n)                 # one x row + one out row (f32)
    op_bytes = 4 * k * n
    budget = 24 << 20                       # conservative double-buffered tile budget
    cap = max(8, min(tile_cap, (budget - 2 * op_bytes) // (2 * row_bytes)))
    cap = max(8, (cap // 8) * 8)

    steps = _cdiv(m, cap)
    # Megacore (v7x only): make the step count even so both TCs get equal work, but
    # only if each half stays a large (>=256 row) tile.  v5e/v6e keep one big step.
    if num_tc > 1 and steps % 2 == 1 and m >= 512 and _cdiv(m, steps + 1) >= 256:
        steps += 1
    if steps == 1:
        tb = m                               # full batch dim — layout-legal as-is
    else:
        tb = min(cap, _round_up(_cdiv(m, steps), 8))
        steps = _cdiv(m, tb)                 # ragged last tile handled by masked stores

    # --- explicit scoped-VMEM limit (v5e default is only 16 MiB) -----------------
    vmem_need = 2 * tb * row_bytes + 2 * op_bytes + (2 << 20)
    vmem_limit = int(min(max(vmem_need, 16 << 20), 64 << 20))

    return pl.pallas_call(
        _gemm_kernel,
        out_shape=jax.ShapeDtypeStruct((m, n), jnp.float32),
        grid_spec=pltpu.PrefetchScalarGridSpec(
            num_scalar_prefetch=0,
            grid=(steps,),
            in_specs=[
                pl.BlockSpec((tb, k), lambda i: (i, 0)),
                # Grid-invariant operator: same block every step (stays resident).
                pl.BlockSpec((k, n), lambda i: (0, 0)),
            ],
            out_specs=pl.BlockSpec((tb, n), lambda i: (i, 0)),
        ),
        compiler_params=pltpu.CompilerParams(
            dimension_semantics=("parallel",),
            vmem_limit_bytes=vmem_limit),
        cost_estimate=pl.CostEstimate(
            flops=2 * m * k * n,
            transcendentals=0,
            bytes_accessed=4 * (m * k + k * n + m * n)),
    )(x2d, op)


# ---------------------------------------------------------------------------
# Public wrapper: MatrixIRFFT2.forward
# ---------------------------------------------------------------------------
def matrix_irfft2(x, height, width, *, force_separable=False, tile_cap=2048):
    """x: [..., height, width//2+1, 2] float -> [..., height, width] float32."""
    x = jnp.asarray(x, dtype=jnp.float32)
    wf = width // 2 + 1
    assert x.shape[-3:] == (height, wf, 2), f"bad input shape {x.shape}"
    batch_dims = x.shape[:-3]
    bflat = int(np.prod(batch_dims)) if batch_dims else 1
    if bflat == 0:                            # degenerate empty batch
        return jnp.zeros(batch_dims + (height, width), jnp.float32)

    fused_op_bytes = 4 * (2 * height * wf) * (height * width)
    use_fused = (not force_separable) and fused_op_bytes <= (6 << 20)

    if use_fused:
        # One GEMM: (B, 2*H*Wf) @ (2*H*Wf, H*W), lane-dense output N = H*W.
        t_op = _fused_operator(height, width)
        x_flat = x.reshape(bflat, height * wf * 2)
        out = _row_gemm(x_flat, t_op, tile_cap=tile_cap)
        return out.reshape(batch_dims + (height, width))

    # Separable fallback for large transforms (fused T too big / too FLOP-inflated):
    # stage 1: height complex IDFT; corner-turn; stage 2: width complex->real IDFT.
    th, tw = _separable_operators(height, width)
    x1 = jnp.transpose(x.reshape(bflat, height, wf, 2), (0, 2, 1, 3))
    x1 = x1.reshape(bflat * wf, 2 * height)                  # rows: (b,k), interleaved (p, re/im)
    y = _row_gemm(x1, th, tile_cap=tile_cap)                 # (B*Wf, 2H) interleaved (h, re/im)
    y = jnp.transpose(y.reshape(bflat, wf, height, 2), (0, 2, 1, 3))
    y = y.reshape(bflat * height, 2 * wf)                    # rows: (b,h), interleaved (k, re/im)
    out = _row_gemm(y, tw, tile_cap=tile_cap)                # (B*H, W)
    return out.reshape(batch_dims + (height, width))


# ---------------------------------------------------------------------------
# Pure-JAX reference mirroring the PyTorch module math (for verification).
# ---------------------------------------------------------------------------
def irfft2_reference(x, height, width):
    hr, hi = map(jnp.asarray, _idft_matrix_np(height))
    wr, wi = map(jnp.asarray, _real_idft_matrix_np(width))
    xr, xi = x[..., 0], x[..., 1]
    yr = jnp.einsum('fp,...pk->...fk', hr, xr) - jnp.einsum('fp,...pk->...fk', hi, xi)
    yi = jnp.einsum('fp,...pk->...fk', hr, xi) + jnp.einsum('fp,...pk->...fk', hi, xr)
    return jnp.einsum('wk,...fk->...fw', wr, yr) - jnp.einsum('wk,...fk->...fw', wi, yi)


if __name__ == "__main__":
    H, W = 16, 16
    Wf = W // 2 + 1
    key = jax.random.PRNGKey(0)
    k1, k2, k3 = jax.random.split(key, 3)

    # 1) Fused path, the module's exact input layout.
    x = jax.random.normal(k1, (2, 4, H, Wf, 2), dtype=jnp.float32)
    out = jax.block_until_ready(matrix_irfft2(x, H, W))
    assert out.shape == (2, 4, H, W)
    ref = irfft2_reference(x, H, W)
    np.testing.assert_allclose(np.asarray(out), np.asarray(ref), rtol=1e-3, atol=1e-4)

    # 2) Genuine (Hermitian) half spectrum: module equals irfft2, recovers the field.
    real_field = jax.random.normal(k2, (2, 4, H, W), dtype=jnp.float32)
    spec = jnp.fft.rfft2(real_field, axes=(-2, -1))
    spec_ri = jnp.stack([jnp.real(spec), jnp.imag(spec)], axis=-1).astype(jnp.float32)
    out2 = jax.block_until_ready(matrix_irfft2(spec_ri, H, W))
    np.testing.assert_allclose(np.asarray(out2), np.asarray(real_field),
                               rtol=1e-3, atol=1e-3)

    # 3) Multi-step grid + ragged (masked) last batch tile — no jnp.pad anywhere.
    x3 = jax.random.normal(k3, (3, 5, H, Wf, 2), dtype=jnp.float32)
    out3 = jax.block_until_ready(matrix_irfft2(x3, H, W, tile_cap=8))
    np.testing.assert_allclose(np.asarray(out3), np.asarray(irfft2_reference(x3, H, W)),
                               rtol=1e-3, atol=2e-4)

    # 4) Separable large-(H,W) fallback path, forced at small shape for verification.
    out4 = jax.block_until_ready(matrix_irfft2(x, H, W, force_separable=True))
    np.testing.assert_allclose(np.asarray(out4), np.asarray(ref), rtol=2e-3, atol=5e-4)

    print("KERNEL_OK")
</pallas_src>

<mosaic_0001>
module attributes {stable_mosaic.version = 11 : i64} {
  func.func @_gemm_kernel(%arg0: i32, %arg1: memref<8x288xf32, #tpu.memory_space<vmem>>, %arg2: memref<288x256xf32, #tpu.memory_space<vmem>>, %arg3: memref<8x256xf32, #tpu.memory_space<vmem>>) attributes {dimension_semantics = [#tpu.dimension_semantics<parallel>], iteration_bounds = array<i64: 1>, scalar_prefetch = 0 : i64, scratch_operands = 0 : i64, tpu.core_type = #tpu.core_type<tc>, window_params = [{transform_indices = @transform_0, window_bounds = array<i64: 8, 288>}, {pipeline_mode = #tpu.pipeline_mode<synchronous>, transform_indices = @transform_1, window_bounds = array<i64: 288, 256>}, {transform_indices = @transform_2, window_bounds = array<i64: 8, 256>}]} {
    %c0 = arith.constant 0 : index
    %c0_0 = arith.constant 0 : index
    %0 = vector.load %arg1[%c0, %c0_0] : memref<8x288xf32, #tpu.memory_space<vmem>>, vector<8x288xf32>
    %c0_1 = arith.constant 0 : index
    %c0_2 = arith.constant 0 : index
    %1 = vector.load %arg2[%c0_1, %c0_2] : memref<288x256xf32, #tpu.memory_space<vmem>>, vector<288x256xf32>
    %cst = arith.constant dense<0.000000e+00> : vector<8x256xf32>
    %2 = tpu.matmul %0, %1, %cst {dimension_numbers = #tpu.dot_dimension_numbers<[1], [0], [0], [1], [0, 0, 1, 1], [], []>} : vector<8x288xf32>, vector<288x256xf32>, vector<8x256xf32> -> vector<8x256xf32>
    %c0_3 = arith.constant 0 : index
    %c0_4 = arith.constant 0 : index
    %3 = vector.load %arg3[%c0_3, %c0_4] : memref<8x256xf32, #tpu.memory_space<vmem>>, vector<8x256xf32>
    tpu.vector_store %arg3[%c0_3, %c0_4], %2 {strides = array<i32>} : memref<8x256xf32, #tpu.memory_space<vmem>>, vector<8x256xf32>,
    return
  }
  func.func @transform_0(%arg0: i32) -> (i32, i32) {
    %c0_i32 = arith.constant 0 : i32
    %c0_i32_0 = arith.constant 0 : i32
    return %arg0, %c0_i32 : i32, i32
  }
  func.func @transform_1(%arg0: i32) -> (i32, i32) {
    %c0_i32 = arith.constant 0 : i32
    %c0_i32_0 = arith.constant 0 : i32
    %c0_i32_1 = arith.constant 0 : i32
    return %c0_i32, %c0_i32_0 : i32, i32
  }
  func.func @transform_2(%arg0: i32) -> (i32, i32) {
    %c0_i32 = arith.constant 0 : i32
    %c0_i32_0 = arith.constant 0 : i32
    return %arg0, %c0_i32 : i32, i32
  }
}

</mosaic_0001>

<bundles_post_ra>
// kernel: tpu_custom_call.1
= control target key start
LH: loop header
LB: loop body
LE: loop exit
PB: predicated region body
PF: predicated region fallthrough
CT: control target
= control target key end

     0   :  { %7 = vsyncpa [#allocation3], 0  ;;  %s494_s0 = inlined_call_operand.hbm [shape: f32[8,288], index: 0, kind: input, shape index: {}]   ;;  %s495_s1 = inlined_call_operand.hbm [shape: f32[288,256], index: 1, kind: input, shape index: {}]   ;;  %s496_s2 = inlined_call_operand.hbm [shape: f32[8,256], index: 2, kind: output, shape index: {}]  }
   0x1   :  { %8 = vsyncpa [#allocation6], 0 }
   0x2   :  { %9 = vsyncpa [#allocation4], 0  ;;  %s430_s9 = smov [#allocation2]   ;;  %s431_s11 = smov [#allocation5]  }
   0x3   :  { %s16_s10 = sshll.u32 %s430_s9, 4  ;;  %s25_s12 = sshll.u32 %s431_s11, 4  ;;  %s17_s10 = int_to_ptr.vmem [resolvable:$true] %s16_s10  ;;  %s451_s12 = int_to_ptr.vmem [resolvable:$true] %s25_s12 }
   0x4   :  { %s358_s15 = scalar_lea.hbm %s494_s0, 384 }
   0x5   :  { %p359_p0 = scmp.ne.s32.totalorder %s494_s0, %s358_s15  ;;  %p362_p1 = scmp.lt.u32.totalorder %s358_s15, %s494_s0 }
   0x7   :  { %p364_p2 = pnand %p362_p1, %p359_p0 }
   0x9   :  { %367 = shalt.err (!%p364_p2)
}
   0xa   :  { %s368_s20 = scalar_lea.vmem %s17_s10, 384  ;;  %p373_p4 = scmp.lt.s32.totalorder %s17_s10, %s17_s10 }
   0xb   :  { %p369_p3 = scmp.ne.s32.totalorder %s17_s10, %s368_s20  ;;  %p374_p5 = scmp.lt.s32.totalorder %s368_s20, %s368_s20 }
   0xd   :  { %p375_p6 = por %p374_p5, %p373_p4 }
   0xf   :  { %p376_p7 = pnand %p375_p6, %p369_p3 }
  0x11   :  { %379 = shalt.err (!%p376_p7)
}
  0x12   :  { %19 = dma.hbm_to_vmem [thread:$0]  %s494_s0, 384, %s17_s10, [#allocation3]  }
  0x13   :  { %s380_s25 = scalar_lea.hbm %s495_s1, 9216 }
  0x14   :  { %p381_p8 = scmp.ne.s32.totalorder %s495_s1, %s380_s25  ;;  %p384_p9 = scmp.lt.u32.totalorder %s380_s25, %s495_s1 }
  0x16   :  { %p386_p10 = pnand %p384_p9, %p381_p8 }
  0x18   :  { %389 = shalt.err (!%p386_p10)
}
  0x19   :  { %s390_s30 = scalar_lea.vmem %s451_s12, 9216  ;;  %p395_p12 = scmp.lt.s32.totalorder %s451_s12, %s451_s12 }
  0x1a   :  { %p391_p11 = scmp.ne.s32.totalorder %s451_s12, %s390_s30  ;;  %p396_p13 = scmp.lt.s32.totalorder %s390_s30, %s390_s30 }
  0x1c   :  { %p397_p0 = por %p396_p13, %p395_p12 }
  0x1e   :  { %p398_p1 = pnand %p397_p0, %p391_p11 }
  0x20   :  { %401 = shalt.err (!%p398_p1)
}
  0x21   :  { %s432_s0 = smov 256   ;;  %s433_s3 = smov 16  }
  0x22   :  { %31 = dma.hbm_to_vmem [thread:$0]  %s495_s1, 9216, %s451_s12, [#allocation6], %s432_s0, %s432_s0, %s433_s3  }
  0x23   :  { %424 = dma.done.wait [#allocation3], 384  }
  0x24   :  { %425 = vsyncadd [#allocation3], 4294966912 }
  0x25   :  { %426 = dma.done.wait [#allocation6], 9216  }
  0x26   :  { %427 = vsyncadd [#allocation6], 4294958080  ;;  %v434_v0 = vmov 0.0   ;;  %v42_v1 = vld [vmem:[#allocation5 + $0x8] sm:$0xff]  ;;  %v44_v2 = vld [vmem:[#allocation5 + $0x18] sm:$0xff]  ;;  %vm113_vm0 = vcmask 261120  }
  0x27   :  { %252 = vmatprep.mubr.f32.mxu0 %v434_v0  ;;  %v41_v3 = vld [vmem:[#allocation5] sm:$0xff]  ;;  %v278_v4 = vpack.c.bf16 %v44_v2, %v42_v1  ;;  %v43_v5 = vld [vmem:[#allocation5 + $0x10] sm:$0xff]  ;;  %v46_v6 = vld [vmem:[#allocation5 + $0x28] sm:$0xff]  ;;  %s435_s1 = smov [#allocation7]  }
  0x28   :  { %v48_v7 = vld [vmem:[#allocation5 + $0x38] sm:$0xff]  ;;  %v280_v8 = vpack.c.bf16 %v43_v5, %v41_v3  ;;  %v45_v10 = vld [vmem:[#allocation5 + $0x20] sm:$0xff]  ;;  %v47_v11 = vld [vmem:[#allocation5 + $0x30] sm:$0xff]  ;;  %s267_s6 = sshll.u32 %s435_s1, 4  ;;  %s268_s6 = int_to_ptr.vmem [resolvable:$true] %s267_s6 }
  0x29   :  { %v282_v9 = vpack.c.bf16 %v48_v7, %v46_v6  ;;  %v50_v12 = vld [vmem:[#allocation5 + $0x48] sm:$0xff]  ;;  %279 = vmatprep.subr.bf16.mxu1 %v278_v4  ;;  %v52_v13 = vld [vmem:[#allocation5 + $0x58] sm:$0xff]  ;;  %v284_v14 = vpack.c.bf16 %v47_v11, %v45_v10  ;;  %v49_v16 = vld [vmem:[#allocation5 + $0x40] sm:$0xff]  ;;  %s402_s7 = scalar_lea.vmem %s268_s6, 256  ;;  %p407_p3 = scmp.lt.s32.totalorder %s268_s6, %s268_s6 }
  0x2a   :  { %281 = vmatpush1.bf16.msra.mxu1 %v280_v8  ;;  %v286_v15 = vpack.c.bf16 %v52_v13, %v50_v12  ;;  %v51_v17 = vld [vmem:[#allocation5 + $0x50] sm:$0xff]  ;;  %v54_v18 = vld [vmem:[#allocation5 + $0x68] sm:$0xff]  ;;  %v56_v19 = vld [vmem:[#allocation5 + $0x78] sm:$0xff]  ;;  %p403_p2 = scmp.ne.s32.totalorder %s268_s6, %s402_s7  ;;  %p408_p4 = scmp.lt.s32.totalorder %s402_s7, %s402_s7 }
  0x2b   :  { %283 = vmatprep.subr.bf16.mxu1 %v282_v9  ;;  %v288_v20 = vpack.c.bf16 %v51_v17, %v49_v16  ;;  %v290_v21 = vpack.c.bf16 %v56_v19, %v54_v18  ;;  %v53_v22 = vld [vmem:[#allocation5 + $0x60] sm:$0xff]  ;;  %v55_v23 = vld [vmem:[#allocation5 + $0x70] sm:$0xff]  ;;  %v58_v24 = vld [vmem:[#allocation5 + $0x88] sm:$0xff] }
  0x2c   :  { %v60_v25 = vld [vmem:[#allocation5 + $0x98] sm:$0xff]  ;;  %v292_v26 = vpack.c.bf16 %v55_v23, %v53_v22  ;;  %v57_v28 = vld [vmem:[#allocation5 + $0x80] sm:$0xff]  ;;  %v59_v29 = vld [vmem:[#allocation5 + $0x90] sm:$0xff]  ;;  %p409_p5 = por %p408_p4, %p407_p3 }
  0x2d   :  { %v294_v27 = vpack.c.bf16 %v60_v25, %v58_v24  ;;  %v62_v30 = vld [vmem:[#allocation5 + $0xa8] sm:$0xff]  ;;  %v64_v31 = vld [vmem:[#allocation5 + $0xb8] sm:$0xff]  ;;  %v296_v32 = vpack.c.bf16 %v59_v29, %v57_v28  ;;  %v61_v34 = vld [vmem:[#allocation5 + $0xa0] sm:$0xff] }
  0x2e   :  { %285 = vmatpush1.bf16.msra.mxu1 %v284_v14  ;;  %v298_v33 = vpack.c.bf16 %v64_v31, %v62_v30  ;;  %v63_v35 = vld [vmem:[#allocation5 + $0xb0] sm:$0xff]  ;;  %v66_v36 = vld [vmem:[#allocation5 + $0xc8] sm:$0xff]  ;;  %v68_v37 = vld [vmem:[#allocation5 + $0xd8] sm:$0xff]  ;;  %p410_p6 = pnand %p409_p5, %p403_p2 }
  0x2f   :  { %287 = vmatprep.subr.bf16.mxu1 %v286_v15  ;;  %v106_v38 = vld [vmem:[#allocation5 + $0x208] sm:$0xff]  ;;  %v108_v39 = vld [vmem:[#allocation5 + $0x218] sm:$0xff]  ;;  %v300_v40 = vpack.c.bf16 %v63_v35, %v61_v34  ;;  %v65_v41 = vld [vmem:[#allocation5 + $0xc0] sm:$0xff]  ;;  %v302_v45 = vpack.c.bf16 %v68_v37, %v66_v36 }
  0x30   :  { %v342_v42 = vpack.c.bf16 %v108_v39, %v106_v38  ;;  %v105_v43 = vld [vmem:[#allocation5 + $0x200] sm:$0xff]  ;;  %v107_v44 = vld [vmem:[#allocation5 + $0x210] sm:$0xff]  ;;  %v110_v48 = vld [vmem:[#allocation5 + $0x228] sm:$0xff] }
  0x31   :  { %v67_v46 = vld [vmem:[#allocation5 + $0xd0] sm:$0xff]  ;;  %v344_v47 = vpack.c.bf16 %v107_v44, %v105_v43  ;;  %v112_v49 = vld [vmem:[#allocation5 + $0x238] sm:$0xff]  ;;  %v70_v50 = vld [vmem:[#allocation5 + $0xe8] sm:$0xff] }
  0x32   :  { %289 = vmatpush1.bf16.msra.mxu1 %v288_v20  ;;  %v72_v51 = vld [vmem:[#allocation5 + $0xf8] sm:$0xff]  ;;  %343 = vmatprep.subr.bf16.mxu0 %v342_v42  ;;  %v346_v52 = vpack.c.bf16 %v112_v49, %v110_v48  ;;  %v109_v53 = vld [vmem:[#allocation5 + $0x220] sm:$0xff]  ;;  %v111_v54 = vld [vmem:[#allocation5 + $0x230] sm:$0xff]  ;;  %v304_v55 = vpack.c.bf16 %v67_v46, %v65_v41 }
  0x33   :  { %291 = vmatprep.subr.bf16.mxu1 %v290_v21  ;;  %345 = vmatpush1.bf16.msra.mxu0 %v344_v47  ;;  %v348_v56 = vpack.c.bf16 %v111_v54, %v109_v53  ;;  %v39_v57 = vld [vmem:[#allocation2 + $0x8] sm:$0xff]  ;;  %v306_v58 = vpack.c.bf16 %v72_v51, %v70_v50  ;;  %v69_v59 = vld [vmem:[#allocation5 + $0xe0] sm:$0xff]  ;;  %v74_v61 = vld [vmem:[#allocation5 + $0x108] sm:$0xff] }
  0x34   :  { %347 = vmatprep.subr.bf16.mxu0 %v346_v52  ;;  %v71_v60 = vld [vmem:[#allocation5 + $0xf0] sm:$0xff]  ;;  %181 = vmatprep.mubr.f32.mxu1 %v39_v57  ;;  %v76_v62 = vld [vmem:[#allocation5 + $0x118] sm:$0xff]  ;;  %v73_v2 = vld [vmem:[#allocation5 + $0x100] sm:$0xff] }
  0x35   :  { %v40_v63 = vld [vmem:[#allocation2 + $0x10] sm:$0xff]  ;;  %v308_v0 = vpack.c.bf16 %v71_v60, %v69_v59  ;;  %v310_v1 = vpack.c.bf16 %v76_v62, %v74_v61  ;;  %v75_v3 = vld [vmem:[#allocation5 + $0x110] sm:$0xff]  ;;  %v78_v4 = vld [vmem:[#allocation5 + $0x128] sm:$0xff] }
  0x36   :  { %293 = vmatpush1.bf16.msra.mxu1 %v292_v26  ;;  %v80_v5 = vld [vmem:[#allocation5 + $0x138] sm:$0xff]  ;;  %v312_v6 = vpack.c.bf16 %v75_v3, %v73_v2  ;;  %v77_v8 = vld [vmem:[#allocation5 + $0x120] sm:$0xff]  ;;  %v79_v9 = vld [vmem:[#allocation5 + $0x130] sm:$0xff] }
  0x37   :  { %295 = vmatprep.subr.bf16.mxu1 %v294_v27  ;;  %349 = vmatpush1.bf16.msra.mxu0 %v348_v56  ;;  %v314_v7 = vpack.c.bf16 %v80_v5, %v78_v4  ;;  %v82_v10 = vld [vmem:[#allocation5 + $0x148] sm:$0xff]  ;;  %v84_v11 = vld [vmem:[#allocation5 + $0x158] sm:$0xff]  ;;  %v316_v12 = vpack.c.bf16 %v79_v9, %v77_v8  ;;  %v81_v14 = vld [vmem:[#allocation5 + $0x140] sm:$0xff] }
  0x38   :  { %v318_v13 = vpack.c.bf16 %v84_v11, %v82_v10  ;;  %v83_v15 = vld [vmem:[#allocation5 + $0x150] sm:$0xff]  ;;  %v86_v16 = vld [vmem:[#allocation5 + $0x168] sm:$0xff]  ;;  %v88_v17 = vld [vmem:[#allocation5 + $0x178] sm:$0xff] }
  0x39   :  { %v320_v18 = vpack.c.bf16 %v83_v15, %v81_v14  ;;  %v322_v19 = vpack.c.bf16 %v88_v17, %v86_v16  ;;  %v85_v20 = vld [vmem:[#allocation5 + $0x160] sm:$0xff]  ;;  %v87_v21 = vld [vmem:[#allocation5 + $0x170] sm:$0xff]  ;;  %v90_v22 = vld [vmem:[#allocation5 + $0x188] sm:$0xff] }
  0x3a   :  { %297 = vmatpush1.bf16.msra.mxu1 %v296_v32  ;;  %277 = vmatmul.mubr.msk.f32.vlgmr.msra.gmra.mrb[0].mxu0 %vm113_vm0, %v40_v63  ;;  %v92_v23 = vld [vmem:[#allocation5 + $0x198] sm:$0xff]  ;;  %v324_v24 = vpack.c.bf16 %v87_v21, %v85_v20  ;;  %v89_v26 = vld [vmem:[#allocation5 + $0x180] sm:$0xff]  ;;  %v91_v27 = vld [vmem:[#allocation5 + $0x190] sm:$0xff] }
  0x3b   :  { %299 = vmatprep.subr.bf16.mxu1 %v298_v33  ;;  %v326_v25 = vpack.c.bf16 %v92_v23, %v90_v22  ;;  %v94_v28 = vld [vmem:[#allocation5 + $0x1a8] sm:$0xff]  ;;  %v96_v29 = vld [vmem:[#allocation5 + $0x1b8] sm:$0xff]  ;;  %v328_v30 = vpack.c.bf16 %v91_v27, %v89_v26  ;;  %v93_v32 = vld [vmem:[#allocation5 + $0x1a0] sm:$0xff] }
  0x3c   :  { %v330_v31 = vpack.c.bf16 %v96_v29, %v94_v28  ;;  %v95_v33 = vld [vmem:[#allocation5 + $0x1b0] sm:$0xff]  ;;  %v98_v34 = vld [vmem:[#allocation5 + $0x1c8] sm:$0xff]  ;;  %v100_v35 = vld [vmem:[#allocation5 + $0x1d8] sm:$0xff] }
  0x3d   :  { %v332_v36 = vpack.c.bf16 %v95_v33, %v93_v32  ;;  %v334_v37 = vpack.c.bf16 %v100_v35, %v98_v34  ;;  %v97_v38 = vld [vmem:[#allocation5 + $0x1c0] sm:$0xff]  ;;  %v99_v39 = vld [vmem:[#allocation5 + $0x1d0] sm:$0xff]  ;;  %v104_v41 = vld [vmem:[#allocation5 + $0x1f8] sm:$0xff] }
  0x3e   :  { %301 = vmatpush1.bf16.msra.mxu1 %v300_v40  ;;  %v102_v40 = vld [vmem:[#allocation5 + $0x1e8] sm:$0xff]  ;;  %v336_v42 = vpack.c.bf16 %v99_v39, %v97_v38  ;;  %v101_v44 = vld [vmem:[#allocation5 + $0x1e0] sm:$0xff] }
  0x3f   :  { %303 = vmatprep.subr.bf16.mxu1 %v302_v45  ;;  %v338_v43 = vpack.c.bf16 %v104_v41, %v102_v40  ;;  %v103_v45 = vld [vmem:[#allocation5 + $0x1f0] sm:$0xff]  ;;  %v38_v47 = vld [vmem:[#allocation2] sm:$0xff] }
  0x40   :  { %v340_v46 = vpack.c.bf16 %v103_v45, %v101_v44 }
  0x42   :  { %305 = vmatpush1.bf16.msra.mxu1 %v304_v55 }
  0x43   :  { %307 = vmatprep.subr.bf16.mxu1 %v306_v58 }
  0x46   :  { %309 = vmatpush1.bf16.msra.mxu1 %v308_v0 }
  0x47   :  { %311 = vmatprep.subr.bf16.mxu1 %v310_v1 }
  0x4a   :  { %313 = vmatpush1.bf16.msra.mxu1 %v312_v6 }
  0x4b   :  { %315 = vmatprep.subr.bf16.mxu1 %v314_v7 }
  0x4e   :  { %317 = vmatpush1.bf16.msra.mxu1 %v316_v12 }
  0x4f   :  { %319 = vmatprep.subr.bf16.mxu1 %v318_v13 }
  0x52   :  { %321 = vmatpush1.bf16.msra.mxu1 %v320_v18 }
  0x53   :  { %323 = vmatprep.subr.bf16.mxu1 %v322_v19 }
  0x56   :  { %325 = vmatpush1.bf16.msra.mxu1 %v324_v24 }
  0x57   :  { %327 = vmatprep.subr.bf16.mxu1 %v326_v25 }
  0x5a   :  { %329 = vmatpush1.bf16.msra.mxu1 %v328_v30 }
  0x5b   :  { %331 = vmatprep.subr.bf16.mxu1 %v330_v31 }
  0x5e   :  { %333 = vmatpush1.bf16.msra.mxu1 %v332_v36 }
  0x5f   :  { %335 = vmatprep.subr.bf16.mxu1 %v334_v37 }
  0x62   :  { %337 = vmatpush1.bf16.msra.mxu1 %v336_v42 }
  0x63   :  { %339 = vmatprep.subr.bf16.mxu1 %v338_v43 }
  0x66   :  { %341 = vmatpush1.bf16.msra.mxu1 %v340_v46 }
  0x69   :  { %182 = vmatmul.mubr.f32.vlgmr.msra.gmra.mrb[0].mxu1 %v38_v47 }
 0x10d   :  { %v254_v48 = vpop.f32.mrb[0].mxu0 }
 0x10e   :  { %v256_v49 = vpop.f32.mrb[1].mxu0 }
 0x13c   :  { %v183_v50 = vpop.f32.mrb[0].mxu1 }
 0x13d   :  { %v255_v51 = vadd.f32 %v254_v48, %v183_v50  ;;  %v185_v52 = vpop.f32.mrb[1].mxu1 }
 0x13e   :  { %v257_v53 = vadd.f32 %v256_v49, %v185_v52 }
 0x13f   :  { %259 = vst [vmem:[#allocation7] sm:$0xff] %v255_v51 }
 0x140   :  { %260 = vst [vmem:[#allocation7 + $0x8] sm:$0xff] %v257_v53 }
 0x141   :  { %413 = shalt.err (!%p410_p6)
}
 0x142   :  { %s414_s10 = scalar_lea.hbm %s496_s2, 256 }
 0x143   :  { %p415_p7 = scmp.ne.s32.totalorder %s496_s2, %s414_s10  ;;  %p418_p8 = scmp.lt.u32.totalorder %s414_s10, %s496_s2 }
 0x145   :  { %p420_p9 = pnand %p418_p8, %p415_p7 }
 0x147   :  { %423 = shalt.err (!%p420_p9)
}
 0x148   :  { %270 = dma.vmem_to_hbm [thread:$0]  %s268_s6, 256, %s496_s2, [#allocation4]  }
 0x149   :  { %428 = dma.done.wait [#allocation4], 256  }
 0x14a   :  { %429 = vsyncadd [#allocation4], 4294967040 }
 0x14b   :  { %274 = vsyncpa [#allocation3], 1 }
 0x14c   :  { %275 = vsyncpa [#allocation6], 1 }
 0x14d   :  { %276 = vsyncpa [#allocation4], 1 }

</bundles_post_ra>
